<compile_context>
chip_gen: v5e
topology: v5e:2x2
jax: 0.10.0
libtpu: 0.0.40
codegen_flags: <defaults>
</compile_context>

<pallas_src>
import functools

import jax
import jax.numpy as jnp
from jax.experimental import pallas as pl
from jax.experimental.pallas import tpu as pltpu


# ---------------------------------------------------------------------------
# Kernel
# ---------------------------------------------------------------------------
def _discriminator_kernel(x_ref, ids_ref,
                          w1_ref, b1_ref,
                          w2_ref, b2_ref,
                          w3_ref, b3_ref,
                          partial_ref,
                          *, total_rows):
    # Cast the streamed tile to bf16 in-kernel (x stays in its stored dtype in
    # HBM -> no separate XLA cast/pad pass re-reading the whole array).
    x = x_ref[...].astype(jnp.bfloat16)

    # fc1 + relu  (bf16 operands, f32 accumulation on the MXU)
    h = jnp.dot(x, w1_ref[...], preferred_element_type=jnp.float32)
    h = jnp.maximum(h + b1_ref[...], 0.0)

    # fc2 + relu
    h = jnp.dot(h.astype(jnp.bfloat16), w2_ref[...],
                preferred_element_type=jnp.float32)
    h = jnp.maximum(h + b2_ref[...], 0.0)

    # fc3 -> logits
    logits = jnp.dot(h.astype(jnp.bfloat16), w3_ref[...],
                     preferred_element_type=jnp.float32)
    logits = logits + b3_ref[...]                                   # [TB, D]

    tb, d = logits.shape

    # Direct NLL: nll_i = logsumexp(logits_i) - logits_i[target_i]
    m = jnp.max(logits, axis=-1, keepdims=True)                     # [TB, 1]
    lse = m + jnp.log(jnp.sum(jnp.exp(logits - m), axis=-1, keepdims=True))

    ids = ids_ref[...]                                              # [TB, 1] i32
    col = jax.lax.broadcasted_iota(jnp.int32, (tb, d), 1)
    onehot = (col == ids).astype(jnp.float32)
    tgt = jnp.sum(onehot * logits, axis=-1, keepdims=True)          # [TB, 1]

    # Ragged last tile: rows past the true batch size are masked in-kernel
    # (jnp.where also kills any NaN/garbage coming from the unspecified
    # out-of-bounds region of the partial block copy).
    row = jax.lax.broadcasted_iota(jnp.int32, (tb, 1), 0) + pl.program_id(0) * tb
    nll = jnp.where(row < total_rows, lse - tgt, 0.0)

    partial_ref[0, 0] = jnp.sum(nll)


# ---------------------------------------------------------------------------
# Sizing helpers (generation-aware)
# ---------------------------------------------------------------------------
def _round_up(x, m):
    return ((x + m - 1) // m) * m


def _padded2d_bytes(rows, cols, itemsize):
    # VMEM layout pads sublanes to 8 and lanes to 128.
    return _round_up(max(rows, 1), 8) * _round_up(max(cols, 1), 128) * itemsize


def _vmem_capacity_bytes():
    try:
        return int(pltpu.get_tpu_info().vmem_capacity_bytes)
    except Exception:
        return 64 << 20   # conservative default (v7x per-TensorCore size)


def _vmem_estimate(tb, n_input, n_hidden, d, x_itemsize):
    # double-buffered streamed tiles (x in its stored dtype; i32 ids lane-pad
    # to (tb, 128) -- counted at padded size).
    stream = 2 * _padded2d_bytes(tb, n_input, x_itemsize) \
           + 2 * _padded2d_bytes(tb, 1, 4)
    # resident weights (bf16) + biases (f32); count 2 buffers to be safe.
    weights = 2 * (_padded2d_bytes(n_input, n_hidden, 2)
                   + _padded2d_bytes(n_hidden, n_hidden, 2)
                   + _padded2d_bytes(n_hidden, d, 2))
    biases = 2 * (2 * _padded2d_bytes(1, n_hidden, 4) + _padded2d_bytes(1, d, 4))
    # in-kernel f32/bf16 temporaries (h, bf16 copies, logits, exp, one-hot).
    scratch = 6 * _round_up(tb, 8) * _round_up(max(n_hidden, d), 128) * 4
    return stream + weights + biases + scratch


def _choose_tb(B, n_input, n_hidden, d, x_itemsize, vmem_cap):
    budget = int(0.55 * vmem_cap)
    tb = 128
    for cand in (2048, 1024, 512, 256, 128):
        if _vmem_estimate(cand, n_input, n_hidden, d, x_itemsize) <= budget:
            tb = cand
            break
    tb = min(tb, _round_up(B, 8))
    # Make sure the "parallel" batch axis has >= 2 tiles so both TensorCores
    # on v7x get work (harmless ~0.35 us extra step on single-TC chips).
    if B >= 16 and pl.cdiv(B, tb) < 2:
        tb = _round_up(pl.cdiv(B, 2), 8)
    return max(tb, 8)


def _vmem_limit_bytes(est, vmem_cap):
    budget = int(0.72 * vmem_cap)
    return int(min(budget, max(2 * est + (4 << 20), 16 << 20)))


# ---------------------------------------------------------------------------
# Wrapper
# ---------------------------------------------------------------------------
@functools.partial(jax.jit, static_argnames=("tb",))
def discriminator_forward(x, batch_ids, params, *, tb=None):
    """x: [B, n_input] f32/bf16, batch_ids: [B] int -> scalar f32 loss."""
    B, n_input = x.shape
    w1, b1, w2, b2, w3, b3 = params
    n_hidden = w1.shape[1]
    d = w3.shape[1]

    x_itemsize = jnp.dtype(x.dtype).itemsize
    vmem_cap = _vmem_capacity_bytes()

    if tb is None:
        tb = _choose_tb(B, n_input, n_hidden, d, x_itemsize, vmem_cap)
    else:
        tb = max(8, _round_up(int(tb), 8))        # sublane rule
        tb = min(tb, _round_up(B, 8))
    num_tiles = pl.cdiv(B, tb)

    # ids: tiny int32 column vector; streamed per tile (lane-pads in VMEM).
    ids = batch_ids.astype(jnp.int32).reshape(B, 1)

    # Weights/biases are tiny (128-wide); cast once, stay VMEM-resident.
    w1b = w1.astype(jnp.bfloat16)
    w2b = w2.astype(jnp.bfloat16)
    w3b = w3.astype(jnp.bfloat16)
    b1f = b1.astype(jnp.float32)
    b2f = b2.astype(jnp.float32)
    b3f = b3.astype(jnp.float32)

    const2 = lambda i: (0, 0)
    in_specs = [
        pl.BlockSpec((tb, n_input), lambda i: (i, 0)),      # x tile (pipelined, native dtype)
        pl.BlockSpec((tb, 1), lambda i: (i, 0)),            # ids tile (pipelined)
        pl.BlockSpec(w1b.shape, const2),                    # resident weights
        pl.BlockSpec(b1f.shape, const2),
        pl.BlockSpec(w2b.shape, const2),
        pl.BlockSpec(b2f.shape, const2),
        pl.BlockSpec(w3b.shape, const2),
        pl.BlockSpec(b3f.shape, const2),
    ]
    # one scalar partial NLL-sum per tile -> parallel-safe, summed in XLA
    out_spec = pl.BlockSpec((1, 1), lambda i: (i, 0),
                            memory_space=pltpu.MemorySpace.SMEM)

    b_eff = num_tiles * tb
    flops = 2 * b_eff * (n_input * n_hidden + n_hidden * n_hidden + n_hidden * d)
    bytes_accessed = (B * n_input * x_itemsize + B * 4
                      + (w1b.size + w2b.size + w3b.size) * 2
                      + (b1f.size + b2f.size + b3f.size) * 4
                      + num_tiles * 4)
    cost = pl.CostEstimate(flops=int(flops),
                           transcendentals=int(b_eff * (d + 1)),
                           bytes_accessed=int(bytes_accessed))

    est = _vmem_estimate(tb, n_input, n_hidden, d, x_itemsize)

    kernel = functools.partial(_discriminator_kernel, total_rows=B)

    partials = pl.pallas_call(
        kernel,
        out_shape=jax.ShapeDtypeStruct((num_tiles, 1), jnp.float32),
        grid_spec=pltpu.PrefetchScalarGridSpec(
            num_scalar_prefetch=0,
            grid=(num_tiles,),
            in_specs=in_specs,
            out_specs=out_spec,
        ),
        compiler_params=pltpu.CompilerParams(
            dimension_semantics=("parallel",),
            vmem_limit_bytes=_vmem_limit_bytes(est, vmem_cap),
        ),
        cost_estimate=cost,
    )(x, ids, w1b, b1f, w2b, b2f, w3b, b3f)

    # reduction='mean' over the true (unpadded) batch size.
    return jnp.sum(partials) / jnp.float32(B)


# ---------------------------------------------------------------------------
# Params / references
# ---------------------------------------------------------------------------
def init_params(key, n_input, domain_number, n_hidden=128):
    """Deterministic synthetic init (PyTorch-Linear-like uniform ranges)."""
    ks = jax.random.split(key, 6)

    def linear(kw, kb, fan_in, fan_out):
        bound = 1.0 / jnp.sqrt(jnp.float32(fan_in))
        # stored as [in, out] (transposed vs. torch's [out, in])
        w = jax.random.uniform(kw, (fan_in, fan_out), jnp.float32, -bound, bound)
        b = jax.random.uniform(kb, (1, fan_out), jnp.float32, -bound, bound)
        return w, b

    w1, b1 = linear(ks[0], ks[1], n_input, n_hidden)
    w2, b2 = linear(ks[2], ks[3], n_hidden, n_hidden)
    w3, b3 = linear(ks[4], ks[5], n_hidden, domain_number)
    return (w1, b1, w2, b2, w3, b3)


def _reference_forward_f32(x, batch_ids, params):
    """Pure-f32 JAX reference of the PyTorch forward."""
    w1, b1, w2, b2, w3, b3 = params
    h = jnp.maximum(x @ w1 + b1, 0.0)
    h = jnp.maximum(h @ w2 + b2, 0.0)
    logits = h @ w3 + b3
    logp = jax.nn.log_softmax(logits, axis=-1)
    nll = -jnp.take_along_axis(logp, batch_ids[:, None].astype(jnp.int32), axis=1)
    return jnp.mean(nll)


def _reference_forward_bf16(x, batch_ids, params):
    """Reference matching the kernel's mixed-precision numerics (bf16 MXU, f32 acc)."""
    w1, b1, w2, b2, w3, b3 = params
    h = jnp.dot(x.astype(jnp.bfloat16), w1.astype(jnp.bfloat16),
                preferred_element_type=jnp.float32) + b1
    h = jnp.maximum(h, 0.0)
    h = jnp.dot(h.astype(jnp.bfloat16), w2.astype(jnp.bfloat16),
                preferred_element_type=jnp.float32) + b2
    h = jnp.maximum(h, 0.0)
    logits = jnp.dot(h.astype(jnp.bfloat16), w3.astype(jnp.bfloat16),
                     preferred_element_type=jnp.float32) + b3
    logp = jax.nn.log_softmax(logits, axis=-1)
    nll = -jnp.take_along_axis(logp, batch_ids[:, None].astype(jnp.int32), axis=1)
    return jnp.mean(nll)


# ---------------------------------------------------------------------------
# Demo
# ---------------------------------------------------------------------------
if __name__ == "__main__":
    key = jax.random.PRNGKey(0)

    # --- small shapes consistent with the module ---------------------------
    k_x, k_ids, k_p = jax.random.split(key, 3)
    B, n_input, domain_number = 8, 32, 6

    x = jax.random.normal(k_x, (B, n_input), jnp.float32)
    batch_ids = jax.random.randint(k_ids, (B,), 0, domain_number, jnp.int32)
    params = init_params(k_p, n_input, domain_number)

    loss = discriminator_forward(x, batch_ids, params)
    jax.block_until_ready(loss)

    ref_bf16 = _reference_forward_bf16(x, batch_ids, params)
    ref_f32 = _reference_forward_f32(x, batch_ids, params)

    # precision-matched reference (bf16 MXU, f32 acc)
    assert jnp.allclose(loss, ref_bf16, atol=2e-3, rtol=2e-3), (loss, ref_bf16)
    # pure-f32 PyTorch-equivalent reference (loose: bf16 feed)
    assert jnp.allclose(loss, ref_f32, atol=5e-2, rtol=5e-2), (loss, ref_f32)

    # --- second check: multi-tile grid + ragged last tile (in-kernel mask) --
    k_x2, k_ids2, k_p2 = jax.random.split(jax.random.PRNGKey(1), 3)
    B2, n_input2, domains2 = 300, 64, 5
    x2 = jax.random.normal(k_x2, (B2, n_input2), jnp.float32)
    ids2 = jax.random.randint(k_ids2, (B2,), 0, domains2, jnp.int32)
    params2 = init_params(k_p2, n_input2, domains2)

    loss2 = discriminator_forward(x2, ids2, params2)
    jax.block_until_ready(loss2)
    ref2 = _reference_forward_f32(x2, ids2, params2)
    assert jnp.allclose(loss2, ref2, atol=5e-2, rtol=5e-2), (loss2, ref2)

    print("KERNEL_OK")
</pallas_src>

<mosaic_0001>
module attributes {stable_mosaic.version = 11 : i64} {
  func.func @_discriminator_kernel(%arg0: i32, %arg1: memref<8x32xf32, #tpu.memory_space<vmem>>, %arg2: memref<8x1xi32, #tpu.memory_space<vmem>>, %arg3: memref<32x128xbf16, #tpu.memory_space<vmem>>, %arg4: memref<1x128xf32, #tpu.memory_space<vmem>>, %arg5: memref<128x128xbf16, #tpu.memory_space<vmem>>, %arg6: memref<1x128xf32, #tpu.memory_space<vmem>>, %arg7: memref<128x6xbf16, #tpu.memory_space<vmem>>, %arg8: memref<1x6xf32, #tpu.memory_space<vmem>>, %arg9: memref<1x1xf32, #tpu.memory_space<smem>>) attributes {dimension_semantics = [#tpu.dimension_semantics<parallel>], iteration_bounds = array<i64: 1>, scalar_prefetch = 0 : i64, scratch_operands = 0 : i64, tpu.core_type = #tpu.core_type<tc>, window_params = [{transform_indices = @transform_0, window_bounds = array<i64: 8, 32>}, {transform_indices = @transform_1, window_bounds = array<i64: 8, 1>}, {pipeline_mode = #tpu.pipeline_mode<synchronous>, transform_indices = @transform_2, window_bounds = array<i64: 32, 128>}, {pipeline_mode = #tpu.pipeline_mode<synchronous>, transform_indices = @transform_3, window_bounds = array<i64: 1, 128>}, {pipeline_mode = #tpu.pipeline_mode<synchronous>, transform_indices = @transform_4, window_bounds = array<i64: 128, 128>}, {pipeline_mode = #tpu.pipeline_mode<synchronous>, transform_indices = @transform_5, window_bounds = array<i64: 1, 128>}, {pipeline_mode = #tpu.pipeline_mode<synchronous>, transform_indices = @transform_6, window_bounds = array<i64: 128, 6>}, {pipeline_mode = #tpu.pipeline_mode<synchronous>, transform_indices = @transform_7, window_bounds = array<i64: 1, 6>}, {transform_indices = @transform_8, window_bounds = array<i64: 1, 1>}]} {
    %c0 = arith.constant 0 : index
    %c0_0 = arith.constant 0 : index
    %0 = vector.load %arg1[%c0, %c0_0] : memref<8x32xf32, #tpu.memory_space<vmem>>, vector<8x32xf32>
    %1 = arith.truncf %0 : vector<8x32xf32> to vector<8x32xbf16>
    %c0_1 = arith.constant 0 : index
    %c0_2 = arith.constant 0 : index
    %2 = vector.load %arg3[%c0_1, %c0_2] : memref<32x128xbf16, #tpu.memory_space<vmem>>, vector<32x128xbf16>
    %cst = arith.constant dense<0.000000e+00> : vector<8x128xf32>
    %3 = tpu.matmul %1, %2, %cst {dimension_numbers = #tpu.dot_dimension_numbers<[1], [0], [0], [1], [0, 0, 1, 1], [], []>} : vector<8x32xbf16>, vector<32x128xbf16>, vector<8x128xf32> -> vector<8x128xf32>
    %c0_3 = arith.constant 0 : index
    %c0_4 = arith.constant 0 : index
    %4 = vector.load %arg4[%c0_3, %c0_4] : memref<1x128xf32, #tpu.memory_space<vmem>>, vector<1x128xf32>
    %5 = vector.broadcast %4 : vector<1x128xf32> to vector<8x128xf32>
    %6 = arith.addf %3, %5 : vector<8x128xf32>
    %cst_5 = arith.constant 0.000000e+00 : f32
    %7 = vector.broadcast %cst_5 : f32 to vector<8x128xf32>
    %8 = arith.maximumf %6, %7 : vector<8x128xf32>
    %9 = arith.truncf %8 : vector<8x128xf32> to vector<8x128xbf16>
    %c0_6 = arith.constant 0 : index
    %c0_7 = arith.constant 0 : index
    %10 = vector.load %arg5[%c0_6, %c0_7] : memref<128x128xbf16, #tpu.memory_space<vmem>>, vector<128x128xbf16>
    %cst_8 = arith.constant dense<0.000000e+00> : vector<8x128xf32>
    %11 = tpu.matmul %9, %10, %cst_8 {dimension_numbers = #tpu.dot_dimension_numbers<[1], [0], [0], [1], [0, 0, 1, 1], [], []>} : vector<8x128xbf16>, vector<128x128xbf16>, vector<8x128xf32> -> vector<8x128xf32>
    %c0_9 = arith.constant 0 : index
    %c0_10 = arith.constant 0 : index
    %12 = vector.load %arg6[%c0_9, %c0_10] : memref<1x128xf32, #tpu.memory_space<vmem>>, vector<1x128xf32>
    %13 = vector.broadcast %12 : vector<1x128xf32> to vector<8x128xf32>
    %14 = arith.addf %11, %13 : vector<8x128xf32>
    %cst_11 = arith.constant 0.000000e+00 : f32
    %15 = vector.broadcast %cst_11 : f32 to vector<8x128xf32>
    %16 = arith.maximumf %14, %15 : vector<8x128xf32>
    %17 = arith.truncf %16 : vector<8x128xf32> to vector<8x128xbf16>
    %c0_12 = arith.constant 0 : index
    %c0_13 = arith.constant 0 : index
    %18 = vector.load %arg7[%c0_12, %c0_13] : memref<128x6xbf16, #tpu.memory_space<vmem>>, vector<128x6xbf16>
    %cst_14 = arith.constant dense<0.000000e+00> : vector<8x6xf32>
    %19 = tpu.matmul %17, %18, %cst_14 {dimension_numbers = #tpu.dot_dimension_numbers<[1], [0], [0], [1], [0, 0, 1, 1], [], []>} : vector<8x128xbf16>, vector<128x6xbf16>, vector<8x6xf32> -> vector<8x6xf32>
    %c0_15 = arith.constant 0 : index
    %c0_16 = arith.constant 0 : index
    %20 = vector.load %arg8[%c0_15, %c0_16] : memref<1x6xf32, #tpu.memory_space<vmem>>, vector<1x6xf32>
    %21 = vector.broadcast %20 : vector<1x6xf32> to vector<8x6xf32>
    %22 = arith.addf %19, %21 : vector<8x6xf32>
    %cst_17 = arith.constant dense<0xFF800000> : vector<8xf32>
    %23 = vector.multi_reduction <maximumf>, %22, %cst_17 [1] : vector<8x6xf32> to vector<8xf32>
    %24 = vector.shape_cast %23 : vector<8xf32> to vector<8x1xf32>
    %25 = vector.broadcast %24 : vector<8x1xf32> to vector<8x6xf32>
    %26 = arith.subf %22, %25 : vector<8x6xf32>
    %27 = math.exp %26 : vector<8x6xf32>
    %cst_18 = arith.constant dense<0.000000e+00> : vector<8xf32>
    %28 = vector.multi_reduction <add>, %27, %cst_18 [1] : vector<8x6xf32> to vector<8xf32>
    %29 = vector.shape_cast %28 : vector<8xf32> to vector<8x1xf32>
    %30 = math.log %29 : vector<8x1xf32>
    %31 = arith.addf %24, %30 : vector<8x1xf32>
    %c0_19 = arith.constant 0 : index
    %c0_20 = arith.constant 0 : index
    %32 = vector.load %arg2[%c0_19, %c0_20] : memref<8x1xi32, #tpu.memory_space<vmem>>, vector<8x1xi32>
    %33 = tpu.iota {dimensions = array<i32: 1>} : vector<8x6xi32>
    %34 = vector.broadcast %32 : vector<8x1xi32> to vector<8x6xi32>
    %35 = arith.cmpi eq, %33, %34 : vector<8x6xi32>
    %36 = arith.extui %35 : vector<8x6xi1> to vector<8x6xi32>
    %37 = arith.sitofp %36 : vector<8x6xi32> to vector<8x6xf32>
    %38 = arith.mulf %37, %22 : vector<8x6xf32>
    %cst_21 = arith.constant dense<0.000000e+00> : vector<8xf32>
    %39 = vector.multi_reduction <add>, %38, %cst_21 [1] : vector<8x6xf32> to vector<8xf32>
    %40 = vector.shape_cast %39 : vector<8xf32> to vector<8x1xf32>
    %41 = tpu.iota {dimensions = array<i32: 0>} : vector<8x1xi32>
    %c8_i32 = arith.constant 8 : i32
    %42 = arith.muli %arg0, %c8_i32 : i32
    %43 = vector.broadcast %42 : i32 to vector<8x1xi32>
    %44 = arith.addi %41, %43 : vector<8x1xi32>
    %c8_i32_22 = arith.constant 8 : i32
    %45 = vector.broadcast %c8_i32_22 : i32 to vector<8x1xi32>
    %46 = arith.cmpi slt, %44, %45 : vector<8x1xi32>
    %47 = arith.subf %31, %40 : vector<8x1xf32>
    %cst_23 = arith.constant 0.000000e+00 : f32
    %48 = vector.broadcast %cst_23 : f32 to vector<8x1xf32>
    %49 = arith.select %46, %47, %48 : vector<8x1xi1>, vector<8x1xf32>
    %50 = vector.shape_cast %49 : vector<8x1xf32> to vector<1x8x1xf32>
    %cst_24 = arith.constant dense<0.000000e+00> : vector<1xf32>
    %51 = vector.multi_reduction <add>, %50, %cst_24 [1, 2] : vector<1x8x1xf32> to vector<1xf32>
    %52 = vector.shape_cast %51 : vector<1xf32> to vector<1x1x1xf32>
    %53 = vector.extract %52[0, 0, 0] : f32 from vector<1x1x1xf32>
    %c0_25 = arith.constant 0 : index
    %c0_26 = arith.constant 0 : index
    %54 = memref.load %arg9[%c0_25, %c0_26] : memref<1x1xf32, #tpu.memory_space<smem>>
    memref.store %53, %arg9[%c0_25, %c0_26] : memref<1x1xf32, #tpu.memory_space<smem>>
    return
  }
  func.func @transform_0(%arg0: i32) -> (i32, i32) {
    %c0_i32 = arith.constant 0 : i32
    %c0_i32_0 = arith.constant 0 : i32
    return %arg0, %c0_i32 : i32, i32
  }
  func.func @transform_1(%arg0: i32) -> (i32, i32) {
    %c0_i32 = arith.constant 0 : i32
    %c0_i32_0 = arith.constant 0 : i32
    return %arg0, %c0_i32 : i32, i32
  }
  func.func @transform_2(%arg0: i32) -> (i32, i32) {
    %c0_i32 = arith.constant 0 : i32
    %c0_i32_0 = arith.constant 0 : i32
    %c0_i32_1 = arith.constant 0 : i32
    return %c0_i32, %c0_i32_0 : i32, i32
  }
  func.func @transform_3(%arg0: i32) -> (i32, i32) {
    %c0_i32 = arith.constant 0 : i32
    %c0_i32_0 = arith.constant 0 : i32
    %c0_i32_1 = arith.constant 0 : i32
    return %c0_i32, %c0_i32_0 : i32, i32
  }
  func.func @transform_4(%arg0: i32) -> (i32, i32) {
    %c0_i32 = arith.constant 0 : i32
    %c0_i32_0 = arith.constant 0 : i32
    %c0_i32_1 = arith.constant 0 : i32
    return %c0_i32, %c0_i32_0 : i32, i32
  }
  func.func @transform_5(%arg0: i32) -> (i32, i32) {
    %c0_i32 = arith.constant 0 : i32
    %c0_i32_0 = arith.constant 0 : i32
    %c0_i32_1 = arith.constant 0 : i32
    return %c0_i32, %c0_i32_0 : i32, i32
  }
  func.func @transform_6(%arg0: i32) -> (i32, i32) {
    %c0_i32 = arith.constant 0 : i32
    %c0_i32_0 = arith.constant 0 : i32
    %c0_i32_1 = arith.constant 0 : i32
    return %c0_i32, %c0_i32_0 : i32, i32
  }
  func.func @transform_7(%arg0: i32) -> (i32, i32) {
    %c0_i32 = arith.constant 0 : i32
    %c0_i32_0 = arith.constant 0 : i32
    %c0_i32_1 = arith.constant 0 : i32
    return %c0_i32, %c0_i32_0 : i32, i32
  }
  func.func @transform_8(%arg0: i32) -> (i32, i32) {
    %c0_i32 = arith.constant 0 : i32
    %c0_i32_0 = arith.constant 0 : i32
    return %arg0, %c0_i32 : i32, i32
  }
}

</mosaic_0001>

<bundles_post_ra>
// kernel: discriminator_forward.1
= control target key start
LH: loop header
LB: loop body
LE: loop exit
PB: predicated region body
PF: predicated region fallthrough
CT: control target
= control target key end

     0   :  { %s540_s0 = inlined_call_operand.vmem [shape: f32[8,32], index: 0, kind: input, shape index: {}]   ;;  %s541_s1 = inlined_call_operand.vmem [shape: s32[8,1], index: 1, kind: input, shape index: {}]   ;;  %s542_s2 = inlined_call_operand.vmem [shape: bf16[32,128], index: 2, kind: input, shape index: {}]   ;;  %s543_s3 = inlined_call_operand.vmem [shape: f32[1,128], index: 3, kind: input, shape index: {}]   ;;  %s544_s4 = inlined_call_operand.vmem [shape: bf16[128,128], index: 4, kind: input, shape index: {}]   ;;  %s545_s5 = inlined_call_operand.vmem [shape: f32[1,128], index: 5, kind: input, shape index: {}]   ;;  %s546_s6 = inlined_call_operand.vmem [shape: bf16[128,6], index: 6, kind: input, shape index: {}]   ;;  %s547_s7 = inlined_call_operand.vmem [shape: f32[1,6], index: 7, kind: input, shape index: {}]   ;;  %s548_s8 = inlined_call_operand.hbm [shape: f32[1,1], index: 8, kind: output, shape index: {}]  }
   0x1   :  { %v373_v0 = vld [vmem:[%s542_s2 + $0x8] sm:$0xff]  ;;  %v381_v1 = vld [vmem:[%s544_s4 + $0x38] sm:$0xff]  ;;  %v372_v2 = vld [vmem:[%s542_s2] sm:$0xff] }
   0x2   :  { %63 = vmatpush.bf16.msra.mxu0 %v373_v0  ;;  %v31_v3 = vld [vmem:[%s540_s0] sm:$0xff]  ;;  %140 = vmatpush.bf16.msra.mxu1 %v381_v1  ;;  %v380_v4 = vld [vmem:[%s544_s4 + $0x30] sm:$0xff] }
   0x3   :  { %13 = vsyncpa [#allocation3], 0  ;;  %v32_v5 = vpack.c.bf16 %v31_v3, %v31_v3  ;;  %vm53_vm0 = vcmask 261120   ;;  %v379_v6 = vld [vmem:[%s544_s4 + $0x28] sm:$0xff]  ;;  %v378_v7 = vld [vmem:[%s544_s4 + $0x20] sm:$0xff]  ;;  %v417_v32 = vmov 0   ;;  %v250_v44 = vlaneseq }
   0x4   :  { %v377_v8 = vld [vmem:[%s544_s4 + $0x18] sm:$0xff]  ;;  %v376_v9 = vld [vmem:[%s544_s4 + $0x10] sm:$0xff]  ;;  %v375_v10 = vld [vmem:[%s544_s4 + $0x8] sm:$0xff]  ;;  %395 = vset.pattern.permute.xlu0 %v417_v32  ;;  %vm236_vm1 = vcmask 48128   ;;  %v418_v47 = vmov 0.0   ;;  %vm270_vm3 = vcmask 7168  }
   0x5   :  { %v374_v11 = vld [vmem:[%s544_s4] sm:$0xff]  ;;  %v389_v12 = vld [vmem:[%s546_s6 + $0x38] sm:$0xff]  ;;  %v388_v13 = vld [vmem:[%s546_s6 + $0x30] sm:$0xff]  ;;  %v251_v45 = vand.u32 127, %v250_v44  ;;  %s288_s21 = sshll.u32 %s548_s8, 4  ;;  %s419_s23 = smov [#allocation2]   ;;  %s289_s21 = int_to_ptr.hbm [resolvable:$true] %s288_s21 }
   0x6   :  { %64 = vmatpush.bf16.msra.mxu0 %v372_v2  ;;  %141 = vmatpush.bf16.msra.mxu1 %v380_v4  ;;  %v387_v14 = vld [vmem:[%s546_s6 + $0x28] sm:$0xff]  ;;  %v386_v15 = vld [vmem:[%s546_s6 + $0x20] sm:$0xff]  ;;  %v385_v16 = vld [vmem:[%s546_s6 + $0x18] sm:$0xff] }
   0x7   :  { %223 = vmatpush.bf16.msra.mxu2 %v389_v12  ;;  %v384_v17 = vld [vmem:[%s546_s6 + $0x10] sm:$0xff]  ;;  %v396_v18 = vld [vmem:[%s543_s3] ss:$0 sm:$0xff]  ;;  %v383_v24 = vld [vmem:[%s546_s6 + $0x8] sm:$0xff] }
   0x8   :  { %v382_v25 = vld [vmem:[%s546_s6] sm:$0xff] }
   0x9   :  { %306 = vmatmul.msk.bf16.vlgmr.msra.gmra.mxu0 %vm53_vm0, %v32_v5  ;;  %v397_v26 = vld [vmem:[%s545_s5] ss:$0 sm:$0xff] }
   0xa   :  { %142 = vmatpush.bf16.msra.mxu1 %v379_v6  ;;  %v398_v33 = vld [vmem:[%s547_s7] ss:$0 sm:$0xff] }
   0xb   :  { %224 = vmatpush.bf16.msra.mxu2 %v388_v13  ;;  %v249_v38 = vld [vmem:[%s541_s1] sm:$0xff] }
   0xe   :  { %143 = vmatpush.bf16.msra.mxu1 %v378_v7 }
   0xf   :  { %225 = vmatpush.bf16.msra.mxu2 %v387_v14 }
  0x12   :  { %144 = vmatpush.bf16.msra.mxu1 %v377_v8 }
  0x13   :  { %226 = vmatpush.bf16.msra.mxu2 %v386_v15 }
  0x16   :  { %145 = vmatpush.bf16.msra.mxu1 %v376_v9 }
  0x17   :  { %227 = vmatpush.bf16.msra.mxu2 %v385_v16 }
  0x1a   :  { %146 = vmatpush.bf16.msra.mxu1 %v375_v10 }
  0x1b   :  { %228 = vmatpush.bf16.msra.mxu2 %v384_v17 }
  0x1e   :  { %147 = vmatpush.bf16.msra.mxu1 %v374_v11 }
  0x1f   :  { %229 = vmatpush.bf16.msra.mxu2 %v383_v24 }
  0x23   :  { %230 = vmatpush.bf16.msra.mxu2 %v382_v25 }
  0x86   :  { %v66_v19 = vpop.f32.mrf.mxu0 }
  0x87   :  { %v67_v20 = vadd.f32 %v396_v18, %v66_v19 }
  0x89   :  { %v70_v21 = vmax.f32 %v67_v20, 0.0 }
  0x8b   :  { %v71_v22 = vpack.c.bf16 %v70_v21, %v70_v21 }
  0x8d   :  { %148 = vmatmul.bf16.vlgmr.msra.gmra.mxu1 %v71_v22 }
  0x8e   :  { %v68_v23 = vpop.f32.mrf.mxu0 }
 0x10a   :  { %v149_v27 = vpop.f32.mrf.mxu1 }
 0x10b   :  { %v150_v28 = vadd.f32 %v397_v26, %v149_v27 }
 0x10d   :  { %v153_v29 = vmax.f32 %v150_v28, 0.0 }
 0x10f   :  { %v154_v30 = vpack.c.bf16 %v153_v29, %v153_v29 }
 0x111   :  { %231 = vmatmul.bf16.vlgmr.msra.gmra.mxu2 %v154_v30 }
 0x112   :  { %v151_v31 = vpop.f32.mrf.mxu1 }
 0x194   :  { %v232_v34 = vpop.f32.mrf.mxu2 }
 0x195   :  { %v233_v35 = vadd.f32 %v398_v33, %v232_v34 }
 0x197   :  { %v237_v36 = vsel %vm236_vm1, %v233_v35, -inf }
 0x198   :  { %238 = vmax.xlane.f32.xlu0 %v237_v36 }
 0x19c   :  { %v234_v37 = vpop.f32.mrf.mxu2 }
 0x1ac   :  { %253 = vperm.xlu0 %395, %v249_v38  }
 0x20b   :  { %v239_v39 = vpop.xlane.xlu0 %238 }
 0x20c   :  { %v240_v40 = vsub.f32 %v233_v35, %v239_v39 }
 0x20e   :  { %v241_v41 = vmul.f32 1.442695, %v240_v40 }
 0x210   :  { %399 = vpow2.f32 %v241_v41 }
 0x216   :  { %v400_v42 = vpop.eup %399 }
 0x217   :  { %v243_v43 = vsel %vm236_vm1, %v400_v42, 0.0 }
 0x218   :  { %244 = vadd.xlane.f32.xlu1 %v243_v43 }
 0x21e   :  { %v254_v46 = vpop.permute.xlu0 %253 }
 0x21f   :  { %vm255_vm2 = vcmp.eq.s32.totalorder %v251_v45, %v254_v46 }
 0x220   :  { %v371_v48 = vsel %vm255_vm2, 1.0, %v418_v47 }
 0x221   :  { %v258_v49 = vmul.f32 %v371_v48, %v233_v35 }
 0x223   :  { %v259_v50 = vsel %vm236_vm1, %v258_v49, 0.0 }
 0x224   :  { %260 = vadd.xlane.f32.xlu1 %v259_v50 }
 0x28b   :  { %v245_v51 = vpop.xlane.xlu1 %244 }
 0x28c   :  { %401 = vlog2.f32 %v245_v51 }
 0x292   :  { %v402_v52 = vpop.eup %401 }
 0x293   :  { %v247_v53 = vmul.f32 0.6931472, %v402_v52 }
 0x295   :  { %v248_v54 = vadd.f32 %v247_v53, %v239_v39 }
 0x297   :  { %v261_v55 = vpop.xlane.xlu1 %260 }
 0x298   :  { %v268_v56 = vsub.f32 %v248_v54, %v261_v55 }
 0x29a   :  { %v271_v57 = vsel %vm270_vm3, %v268_v56, 0.0 }
 0x29b   :  { %272 = vadd.xlane.f32.xlu2 %v271_v57 }
 0x30e   :  { %v273_v58 = vpop.xlane.xlu2 %272 }
 0x30f   :  { %v274_v59 = vrot.slane %v273_v58, 4 }
 0x311   :  { %v275_v60 = vadd.f32 %v274_v59, %v273_v58 }
 0x313   :  { %v276_v61 = vrot.slane %v275_v60, 2 }
 0x315   :  { %v277_v62 = vadd.f32 %v276_v61, %v275_v60 }
 0x317   :  { %v278_v63 = vrot.slane %v277_v62, 1 }
 0x319   :  { %v279_v0 = vadd.f32 %v278_v63, %v277_v62 }
 0x31b   :  { %390 = vpush %v279_v0 }
 0x34c   :  { %s391_s22 = spop %390 }
 0x34d   :  { %282 = sst [smem:[#allocation2]] %s391_s22 }
 0x34e   :  { %291 = dma.smem_to_hbm %s419_s23, 16, %s289_s21, [#allocation3]  }
 0x34f   :  { %415 = dma.done.wait [#allocation3], 16  }
 0x350   :  { %416 = vsyncadd [#allocation3], 4294967280 }
 0x351   :  { %296 = sfence }
 0x352   :  { %297 = vsyncpa [#allocation3], 1 }

</bundles_post_ra>
